<compile_context>
chip_gen: v6e
topology: v6e:2x2x1
jax: 0.10.0
libtpu: 0.0.40
codegen_flags: <defaults>
</compile_context>

<pallas_src>
import jax
import jax.numpy as jnp
from jax.experimental import pallas as pl
from jax.experimental.pallas import tpu as pltpu


def _round_up(v: int, m: int) -> int:
    return (v + m - 1) // m * m


def _feature_pad(d: int) -> int:
    # v6e/v7x MXU is 2x256x256 -> align genuinely-large dims to 256; keep 128
    # alignment for small dims so we don't inflate FLOPs (and stay friendly to
    # v5e's 4x128x128 MXUs).
    return _round_up(d, 256) if d >= 256 else _round_up(d, 128)


def _vmem_cap_bytes() -> int:
    """~85% of this generation's per-core VMEM; conservative fallback."""
    try:
        info = pltpu.get_tpu_info()
        cap = getattr(info, "vmem_capacity_bytes", None)
        if cap:
            return int(0.85 * int(cap))
    except Exception:
        pass
    return 64 * 1024 * 1024  # safe on every generation (v7x physical = 64 MiB)


def _make_resnet_kernel(num_hidden: int, outd: int, softmax: bool, mxu_dtype,
                        stream_hidden: bool):
    """Builds the Pallas kernel body for a static depth / output width."""

    if mxu_dtype is None:
        cast = lambda a: a
    else:
        cast = lambda a: a.astype(mxu_dtype)

    def _mm(a, w):
        # MXU matmul; inputs optionally bf16, accumulation always f32.
        return jnp.dot(cast(a), w, preferred_element_type=jnp.float32)

    def _epilogue(out, o_ref):
        if softmax:
            # Padded output columns must not contribute to the softmax sum.
            col = jax.lax.broadcasted_iota(jnp.int32, out.shape, 1)
            out = jnp.where(col < outd, out, -jnp.inf)
            m = jnp.max(out, axis=-1, keepdims=True)
            e = jnp.exp(out - m)
            s = jnp.sum(e, axis=-1, keepdims=True)
            inv = pl.reciprocal(s, approx=True)       # EUP slot (cheap)
            inv = inv * (2.0 - s * inv)               # 1 Newton step -> ~exact
            out = e * inv
        o_ref[...] = out.astype(o_ref.dtype)

    if num_hidden == 0:
        def kernel(x_ref, w1_ref, b1_ref, wout_ref, bout_ref, o_ref):
            x = x_ref[...].astype(jnp.float32)
            h = jnp.maximum(_mm(x, w1_ref[...]) + b1_ref[...], 0.0)
            _epilogue(_mm(h, wout_ref[...]) + bout_ref[...], o_ref)
        return kernel

    if not stream_hidden:
        def kernel(x_ref, w1_ref, b1_ref, wh_ref, bh_ref, wout_ref, bout_ref,
                   o_ref):
            x = x_ref[...].astype(jnp.float32)
            h = jnp.maximum(_mm(x, w1_ref[...]) + b1_ref[...], 0.0)
            for i in range(num_hidden):           # static unroll
                y = _mm(h, wh_ref[i]) + bh_ref[i]
                h = jnp.maximum(y, 0.0) + h
            _epilogue(_mm(h, wout_ref[...]) + bout_ref[...], o_ref)
        return kernel

    # Streaming variant: wh stays in HBM; 2-slot VMEM double buffer.
    def kernel(x_ref, w1_ref, b1_ref, wh_hbm, bh_ref, wout_ref, bout_ref,
               o_ref, wh_buf, wh_sem):
        # Prefetch hidden layer 0 so the DMA hides behind the input matmul.
        pltpu.make_async_copy(wh_hbm.at[0], wh_buf.at[0], wh_sem.at[0]).start()

        x = x_ref[...].astype(jnp.float32)
        h = jnp.maximum(_mm(x, w1_ref[...]) + b1_ref[...], 0.0)

        for i in range(num_hidden):               # static unroll
            slot = i % 2
            pltpu.make_async_copy(wh_hbm.at[i], wh_buf.at[slot],
                                  wh_sem.at[slot]).wait()
            if i + 1 < num_hidden:
                nxt = 1 - slot
                pltpu.make_async_copy(wh_hbm.at[i + 1], wh_buf.at[nxt],
                                      wh_sem.at[nxt]).start()
            y = _mm(h, wh_buf[slot]) + bh_ref[i]
            h = jnp.maximum(y, 0.0) + h

        _epilogue(_mm(h, wout_ref[...]) + bout_ref[...], o_ref)

    return kernel


def resnet_forward(x, params, *, softmax: bool = False, block_batch=None,
                   mxu_dtype=jnp.bfloat16, stream_hidden=None,
                   stream_threshold_bytes: int = 24 * 1024 * 1024):
    """Runs the ResNet forward as one batch-gridded Pallas call.

    params: dict with
      'w1'  : (ind, width)          'b1'  : (width,)
      'wh'  : (num_hidden, width, width) or None
      'bh'  : (num_hidden, width)        or None
      'wout': (width, outd)         'bout': (outd,)
    Weights are in (in_features, out_features) layout (transposed vs PyTorch).
    """
    n, ind = x.shape
    width = params["w1"].shape[1]
    outd = params["wout"].shape[1]
    num_hidden = 0 if params["wh"] is None else int(params["wh"].shape[0])

    f32 = jnp.float32
    wdt = jnp.dtype(f32) if mxu_dtype is None else jnp.dtype(mxu_dtype)

    # Lane-dense (and MXU-friendly) padding of the feature dims.
    width_p = _feature_pad(width)
    outd_p = _feature_pad(outd)

    # Batch tile. Large default for narrow / overhead-bound configs; always a
    # sublane multiple; always <= ceil(n/2) so we get >= 2 grid blocks and the
    # v7x megacore can shard the "parallel" batch axis.
    if block_batch is None:
        block_batch = 1024 if width_p <= 256 else 256
    tb = _round_up(int(block_batch), 8)
    tb = min(tb, _round_up(pl.cdiv(n, 2), 8))
    tb = max(8, tb)
    n_p = _round_up(n, tb)
    n_blocks = n_p // tb

    # Stream the hidden weights layer-by-layer only when keeping them fully
    # resident would eat too much VMEM (v7x: 64 MiB/TC, duplicated per core).
    wh_bytes = num_hidden * width_p * width_p * wdt.itemsize
    if stream_hidden is None:
        stream_hidden = wh_bytes > stream_threshold_bytes
    stream_hidden = bool(stream_hidden) and num_hidden > 0

    # ---- Pad / cast parameters (zero padding keeps padded lanes exactly 0). -
    x_p = jnp.zeros((n_p, ind), x.dtype).at[:n].set(x)
    w1_p = jnp.zeros((ind, width_p), wdt).at[:, :width].set(
        params["w1"].astype(wdt))
    b1_p = jnp.zeros((1, width_p), f32).at[0, :width].set(
        params["b1"].astype(f32))
    wout_p = jnp.zeros((width_p, outd_p), wdt).at[:width, :outd].set(
        params["wout"].astype(wdt))
    bout_p = jnp.zeros((1, outd_p), f32).at[0, :outd].set(
        params["bout"].astype(f32))

    # Grid-invariant inputs: single resident VMEM copy (no pipelining, no
    # double-buffer duplication).
    resident = pl.BlockSpec(memory_space=pltpu.MemorySpace.VMEM)
    x_spec = pl.BlockSpec((tb, ind), lambda i: (i, 0))
    out_spec = pl.BlockSpec((tb, outd_p), lambda i: (i, 0))

    args = [x_p, w1_p, b1_p]
    in_specs = [x_spec, resident, resident]
    scratch_shapes = []

    if num_hidden > 0:
        wh_p = jnp.zeros((num_hidden, width_p, width_p), wdt).at[
            :, :width, :width].set(params["wh"].astype(wdt))
        bh_p = jnp.zeros((num_hidden, 1, width_p), f32).at[
            :, 0, :width].set(params["bh"].astype(f32))
        args += [wh_p, bh_p]
        if stream_hidden:
            in_specs += [pl.BlockSpec(memory_space=pl.ANY), resident]
            scratch_shapes = [pltpu.VMEM((2, width_p, width_p), wdt),
                              pltpu.SemaphoreType.DMA((2,))]
        else:
            in_specs += [resident, resident]

    args += [wout_p, bout_p]
    in_specs += [resident, resident]

    # ---- VMEM budget & cost estimate. ---------------------------------------
    resident_bytes = sum(int(a.size) * a.dtype.itemsize for a in args[1:])
    if stream_hidden:
        resident_bytes -= wh_bytes                      # wh stays in HBM
        resident_bytes += 2 * width_p * width_p * wdt.itemsize  # 2-slot buffer
    out_itemsize = jnp.dtype(x.dtype).itemsize
    tile_bytes = 2 * (tb * ind * x_p.dtype.itemsize + tb * outd_p * out_itemsize)
    act_bytes = 6 * tb * width_p * 4                    # h / y / cast slack
    vmem_need = resident_bytes + tile_bytes + act_bytes
    vmem_limit = int(min(max(int(1.5 * vmem_need), 16 * 1024 * 1024),
                         _vmem_cap_bytes()))

    flops = 2 * n_p * (ind * width_p
                       + num_hidden * width_p * width_p
                       + width_p * outd_p)
    transcendentals = n_p * outd_p if softmax else 0
    bytes_accessed = (sum(int(a.size) * a.dtype.itemsize for a in args)
                      + (n_blocks - 1) * wh_bytes * int(stream_hidden)
                      + n_p * outd_p * out_itemsize)
    cost = pl.CostEstimate(flops=flops, transcendentals=transcendentals,
                           bytes_accessed=bytes_accessed)

    kernel = _make_resnet_kernel(num_hidden, outd, softmax,
                                 None if mxu_dtype is None else wdt,
                                 stream_hidden)
    out_p = pl.pallas_call(
        kernel,
        out_shape=jax.ShapeDtypeStruct((n_p, outd_p), x.dtype),
        grid=(n_blocks,),
        in_specs=in_specs,
        out_specs=out_spec,
        scratch_shapes=scratch_shapes,
        compiler_params=pltpu.CompilerParams(
            dimension_semantics=("parallel",),
            vmem_limit_bytes=vmem_limit),
        cost_estimate=cost,
    )(*args)

    return out_p[:n, :outd]


def init_params(key, ind, outd, layers, width, dtype=jnp.float32):
    """Synthetic init mirroring the module's parameter shapes (layers > 1).

    PyTorch Linear stores weight as (out, in); we store the transposed
    (in, out) form directly. Biases are 0 (as in the module's __initialize).
    """
    assert layers > 1, "this wrapper mirrors the layers > 1 branch"
    keys = jax.random.split(key, layers)
    scale1 = 1.0 / jnp.sqrt(ind)
    w1 = jax.random.uniform(keys[0], (ind, width), dtype, -scale1, scale1)
    b1 = jnp.zeros((width,), dtype)

    num_hidden = layers - 2
    if num_hidden > 0:
        scale_h = 1.0 / jnp.sqrt(width)
        wh = jax.random.uniform(keys[1], (num_hidden, width, width), dtype,
                                -scale_h, scale_h)
        bh = jnp.zeros((num_hidden, width), dtype)
    else:
        wh, bh = None, None

    scale_o = 1.0 / jnp.sqrt(width)
    wout = jax.random.uniform(keys[-1], (width, outd), dtype, -scale_o, scale_o)
    bout = jnp.zeros((outd,), dtype)
    return {"w1": w1, "b1": b1, "wh": wh, "bh": bh, "wout": wout, "bout": bout}


def resnet_reference(x, params, *, softmax: bool = False):
    """Pure-JAX reference for correctness checking."""
    h = jax.nn.relu(x @ params["w1"] + params["b1"])
    if params["wh"] is not None:
        for i in range(params["wh"].shape[0]):
            h = jax.nn.relu(h @ params["wh"][i] + params["bh"][i]) + h
    out = h @ params["wout"] + params["bout"]
    if softmax:
        out = jax.nn.softmax(out, axis=-1)
    return out


if __name__ == "__main__":
    key = jax.random.PRNGKey(0)
    kx, kp, kx2, kp2 = jax.random.split(key, 4)

    # Config mirroring ResNet(ind=4, outd=4, layers=4, width=32).
    ind, outd, layers, width = 4, 4, 4, 32
    batch = 8
    x = jax.random.normal(kx, (batch, ind), jnp.float32)
    params = init_params(kp, ind, outd, layers, width)
    ref = resnet_reference(x, params, softmax=False)

    # 1) f32 MXU path, no softmax — exact parity.
    out = jax.block_until_ready(
        resnet_forward(x, params, softmax=False, mxu_dtype=jnp.float32))
    assert out.shape == (batch, outd)
    assert jnp.allclose(out, ref, atol=1e-5, rtol=1e-5), "f32 mismatch"

    # 2) Default bf16-MXU path (f32 accumulation / elementwise).
    out_bf = jax.block_until_ready(resnet_forward(x, params, softmax=False))
    assert jnp.allclose(out_bf, ref, atol=5e-2, rtol=5e-2), "bf16 mismatch"

    # 3) Softmax epilogue (Newton-refined EUP reciprocal), f32 path.
    out_sm = jax.block_until_ready(
        resnet_forward(x, params, softmax=True, mxu_dtype=jnp.float32))
    ref_sm = resnet_reference(x, params, softmax=True)
    assert jnp.allclose(out_sm, ref_sm, atol=1e-4, rtol=1e-4), "softmax mismatch"

    # 4) Larger, non-multiple batch: exercises batch grid + padding + >=2 blocks.
    xb = jax.random.normal(kx2, (300, ind), jnp.float32)
    out_b = jax.block_until_ready(
        resnet_forward(xb, params, softmax=False, mxu_dtype=jnp.float32))
    ref_b = resnet_reference(xb, params, softmax=False)
    assert out_b.shape == (300, outd)
    assert jnp.allclose(out_b, ref_b, atol=1e-5, rtol=1e-5), "gridded mismatch"

    # 5) layers=2 branch (no hidden residual blocks).
    params2 = init_params(kp2, ind, outd, 2, width)
    out2 = jax.block_until_ready(
        resnet_forward(x, params2, softmax=False, mxu_dtype=jnp.float32))
    ref2 = resnet_reference(x, params2, softmax=False)
    assert jnp.allclose(out2, ref2, atol=1e-5, rtol=1e-5), "layers=2 mismatch"

    # 6) Forced hidden-weight streaming path (HBM + manual double buffer).
    out_s = jax.block_until_ready(
        resnet_forward(x, params, softmax=False, mxu_dtype=jnp.float32,
                       stream_hidden=True))
    assert jnp.allclose(out_s, ref, atol=1e-5, rtol=1e-5), "streamed mismatch"

    print("KERNEL_OK")
</pallas_src>

<mosaic_0001>
module attributes {stable_mosaic.version = 11 : i64} {
  func.func @kernel(%arg0: i32, %arg1: memref<8x4xf32, #tpu.memory_space<vmem>>, %arg2: memref<4x128xf32, #tpu.memory_space<vmem>>, %arg3: memref<1x128xf32, #tpu.memory_space<vmem>>, %arg4: memref<2x128x128xf32, #tpu.memory_space<vmem>>, %arg5: memref<2x1x128xf32, #tpu.memory_space<vmem>>, %arg6: memref<128x128xf32, #tpu.memory_space<vmem>>, %arg7: memref<1x128xf32, #tpu.memory_space<vmem>>, %arg8: memref<8x128xf32, #tpu.memory_space<vmem>>) attributes {dimension_semantics = [#tpu.dimension_semantics<parallel>], iteration_bounds = array<i64: 1>, scalar_prefetch = 0 : i64, scratch_operands = 0 : i64, tpu.core_type = #tpu.core_type<tc>, window_params = [{transform_indices = @transform_0, window_bounds = array<i64: 8, 4>}, {pipeline_mode = #tpu.pipeline_mode<synchronous>, transform_indices = @transform_1, window_bounds = array<i64: 4, 128>}, {pipeline_mode = #tpu.pipeline_mode<synchronous>, transform_indices = @transform_2, window_bounds = array<i64: 1, 128>}, {pipeline_mode = #tpu.pipeline_mode<synchronous>, transform_indices = @transform_3, window_bounds = array<i64: 2, 128, 128>}, {pipeline_mode = #tpu.pipeline_mode<synchronous>, transform_indices = @transform_4, window_bounds = array<i64: 2, 1, 128>}, {pipeline_mode = #tpu.pipeline_mode<synchronous>, transform_indices = @transform_5, window_bounds = array<i64: 128, 128>}, {pipeline_mode = #tpu.pipeline_mode<synchronous>, transform_indices = @transform_6, window_bounds = array<i64: 1, 128>}, {transform_indices = @transform_7, window_bounds = array<i64: 8, 128>}]} {
    %c0 = arith.constant 0 : index
    %c0_0 = arith.constant 0 : index
    %0 = vector.load %arg1[%c0, %c0_0] : memref<8x4xf32, #tpu.memory_space<vmem>>, vector<8x4xf32>
    %c0_1 = arith.constant 0 : index
    %c0_2 = arith.constant 0 : index
    %1 = vector.load %arg2[%c0_1, %c0_2] : memref<4x128xf32, #tpu.memory_space<vmem>>, vector<4x128xf32>
    %cst = arith.constant dense<0.000000e+00> : vector<8x128xf32>
    %2 = tpu.matmul %0, %1, %cst {dimension_numbers = #tpu.dot_dimension_numbers<[1], [0], [0], [1], [0, 0, 1, 1], [], []>} : vector<8x4xf32>, vector<4x128xf32>, vector<8x128xf32> -> vector<8x128xf32>
    %c0_3 = arith.constant 0 : index
    %c0_4 = arith.constant 0 : index
    %3 = vector.load %arg3[%c0_3, %c0_4] : memref<1x128xf32, #tpu.memory_space<vmem>>, vector<1x128xf32>
    %4 = vector.broadcast %3 : vector<1x128xf32> to vector<8x128xf32>
    %5 = arith.addf %2, %4 : vector<8x128xf32>
    %cst_5 = arith.constant 0.000000e+00 : f32
    %6 = vector.broadcast %cst_5 : f32 to vector<8x128xf32>
    %7 = arith.maximumf %5, %6 : vector<8x128xf32>
    %c0_6 = arith.constant 0 : index
    %c0_7 = arith.constant 0 : index
    %c0_8 = arith.constant 0 : index
    %8 = vector.load %arg4[%c0_6, %c0_7, %c0_8] : memref<2x128x128xf32, #tpu.memory_space<vmem>>, vector<1x128x128xf32>
    %9 = vector.shape_cast %8 : vector<1x128x128xf32> to vector<128x128xf32>
    %cst_9 = arith.constant dense<0.000000e+00> : vector<8x128xf32>
    %10 = tpu.matmul %7, %9, %cst_9 {dimension_numbers = #tpu.dot_dimension_numbers<[1], [0], [0], [1], [0, 0, 1, 1], [], []>} : vector<8x128xf32>, vector<128x128xf32>, vector<8x128xf32> -> vector<8x128xf32>
    %c0_10 = arith.constant 0 : index
    %c0_11 = arith.constant 0 : index
    %c0_12 = arith.constant 0 : index
    %11 = vector.load %arg5[%c0_10, %c0_11, %c0_12] : memref<2x1x128xf32, #tpu.memory_space<vmem>>, vector<1x1x128xf32>
    %12 = vector.shape_cast %11 : vector<1x1x128xf32> to vector<1x128xf32>
    %13 = vector.broadcast %12 : vector<1x128xf32> to vector<8x128xf32>
    %14 = arith.addf %10, %13 : vector<8x128xf32>
    %cst_13 = arith.constant 0.000000e+00 : f32
    %15 = vector.broadcast %cst_13 : f32 to vector<8x128xf32>
    %16 = arith.maximumf %14, %15 : vector<8x128xf32>
    %17 = arith.addf %16, %7 : vector<8x128xf32>
    %c1 = arith.constant 1 : index
    %c0_14 = arith.constant 0 : index
    %c0_15 = arith.constant 0 : index
    %18 = vector.load %arg4[%c1, %c0_14, %c0_15] : memref<2x128x128xf32, #tpu.memory_space<vmem>>, vector<1x128x128xf32>
    %19 = vector.shape_cast %18 : vector<1x128x128xf32> to vector<128x128xf32>
    %cst_16 = arith.constant dense<0.000000e+00> : vector<8x128xf32>
    %20 = tpu.matmul %17, %19, %cst_16 {dimension_numbers = #tpu.dot_dimension_numbers<[1], [0], [0], [1], [0, 0, 1, 1], [], []>} : vector<8x128xf32>, vector<128x128xf32>, vector<8x128xf32> -> vector<8x128xf32>
    %c1_17 = arith.constant 1 : index
    %c0_18 = arith.constant 0 : index
    %c0_19 = arith.constant 0 : index
    %21 = vector.load %arg5[%c1_17, %c0_18, %c0_19] : memref<2x1x128xf32, #tpu.memory_space<vmem>>, vector<1x1x128xf32>
    %22 = vector.shape_cast %21 : vector<1x1x128xf32> to vector<1x128xf32>
    %23 = vector.broadcast %22 : vector<1x128xf32> to vector<8x128xf32>
    %24 = arith.addf %20, %23 : vector<8x128xf32>
    %cst_20 = arith.constant 0.000000e+00 : f32
    %25 = vector.broadcast %cst_20 : f32 to vector<8x128xf32>
    %26 = arith.maximumf %24, %25 : vector<8x128xf32>
    %27 = arith.addf %26, %17 : vector<8x128xf32>
    %c0_21 = arith.constant 0 : index
    %c0_22 = arith.constant 0 : index
    %28 = vector.load %arg6[%c0_21, %c0_22] : memref<128x128xf32, #tpu.memory_space<vmem>>, vector<128x128xf32>
    %cst_23 = arith.constant dense<0.000000e+00> : vector<8x128xf32>
    %29 = tpu.matmul %27, %28, %cst_23 {dimension_numbers = #tpu.dot_dimension_numbers<[1], [0], [0], [1], [0, 0, 1, 1], [], []>} : vector<8x128xf32>, vector<128x128xf32>, vector<8x128xf32> -> vector<8x128xf32>
    %c0_24 = arith.constant 0 : index
    %c0_25 = arith.constant 0 : index
    %30 = vector.load %arg7[%c0_24, %c0_25] : memref<1x128xf32, #tpu.memory_space<vmem>>, vector<1x128xf32>
    %31 = vector.broadcast %30 : vector<1x128xf32> to vector<8x128xf32>
    %32 = arith.addf %29, %31 : vector<8x128xf32>
    %c0_26 = arith.constant 0 : index
    %c0_27 = arith.constant 0 : index
    %33 = vector.load %arg8[%c0_26, %c0_27] : memref<8x128xf32, #tpu.memory_space<vmem>>, vector<8x128xf32>
    tpu.vector_store %arg8[%c0_26, %c0_27], %32 {strides = array<i32>} : memref<8x128xf32, #tpu.memory_space<vmem>>, vector<8x128xf32>,
    return
  }
  func.func @transform_0(%arg0: i32) -> (i32, i32) {
    %c0_i32 = arith.constant 0 : i32
    %c0_i32_0 = arith.constant 0 : i32
    return %arg0, %c0_i32 : i32, i32
  }
  func.func @transform_1(%arg0: i32) -> (i32, i32) {
    %c0_i32 = arith.constant 0 : i32
    %c0_i32_0 = arith.constant 0 : i32
    %c0_i32_1 = arith.constant 0 : i32
    return %c0_i32, %c0_i32_0 : i32, i32
  }
  func.func @transform_2(%arg0: i32) -> (i32, i32) {
    %c0_i32 = arith.constant 0 : i32
    %c0_i32_0 = arith.constant 0 : i32
    %c0_i32_1 = arith.constant 0 : i32
    return %c0_i32, %c0_i32_0 : i32, i32
  }
  func.func @transform_3(%arg0: i32) -> (i32, i32, i32) {
    %c0_i32 = arith.constant 0 : i32
    %c0_i32_0 = arith.constant 0 : i32
    %c0_i32_1 = arith.constant 0 : i32
    %c0_i32_2 = arith.constant 0 : i32
    return %c0_i32, %c0_i32_0, %c0_i32_1 : i32, i32, i32
  }
  func.func @transform_4(%arg0: i32) -> (i32, i32, i32) {
    %c0_i32 = arith.constant 0 : i32
    %c0_i32_0 = arith.constant 0 : i32
    %c0_i32_1 = arith.constant 0 : i32
    %c0_i32_2 = arith.constant 0 : i32
    return %c0_i32, %c0_i32_0, %c0_i32_1 : i32, i32, i32
  }
  func.func @transform_5(%arg0: i32) -> (i32, i32) {
    %c0_i32 = arith.constant 0 : i32
    %c0_i32_0 = arith.constant 0 : i32
    %c0_i32_1 = arith.constant 0 : i32
    return %c0_i32, %c0_i32_0 : i32, i32
  }
  func.func @transform_6(%arg0: i32) -> (i32, i32) {
    %c0_i32 = arith.constant 0 : i32
    %c0_i32_0 = arith.constant 0 : i32
    %c0_i32_1 = arith.constant 0 : i32
    return %c0_i32, %c0_i32_0 : i32, i32
  }
  func.func @transform_7(%arg0: i32) -> (i32, i32) {
    %c0_i32 = arith.constant 0 : i32
    %c0_i32_0 = arith.constant 0 : i32
    return %arg0, %c0_i32 : i32, i32
  }
}

</mosaic_0001>

<bundles_post_ra>
// kernel: tpu_custom_call.1
= control target key start
LH: loop header
LB: loop body
LE: loop exit
PB: predicated region body
PF: predicated region fallthrough
CT: control target
= control target key end

     0   :  { %12 = vsyncpa [#allocation3], 0  ;;  %s819_s0 = inlined_call_operand.vmem [shape: f32[8,4], index: 0, kind: input, shape index: {}]   ;;  %s820_s1 = inlined_call_operand.vmem [shape: f32[4,128], index: 1, kind: input, shape index: {}]   ;;  %s821_s2 = inlined_call_operand.vmem [shape: f32[1,128], index: 2, kind: input, shape index: {}]   ;;  %s822_s3 = inlined_call_operand.hbm [shape: f32[2,128,128], index: 3, kind: input, shape index: {}]   ;;  %s823_s4 = inlined_call_operand.vmem [shape: f32[2,1,128], index: 4, kind: input, shape index: {}]   ;;  %s824_s5 = inlined_call_operand.hbm [shape: f32[128,128], index: 5, kind: input, shape index: {}]   ;;  %s825_s6 = inlined_call_operand.vmem [shape: f32[1,128], index: 6, kind: input, shape index: {}]   ;;  %s826_s7 = inlined_call_operand.hbm [shape: f32[8,128], index: 7, kind: output, shape index: {}]  }
   0x1   :  { %13 = vsyncpa [#allocation6], 0 }
   0x2   :  { %14 = vsyncpa [#allocation4], 0  ;;  %s688_s24 = smov [#allocation2]  }
   0x3   :  { %s26_s25 = sshll.u32 %s688_s24, 4  ;;  %s27_s25 = int_to_ptr.vmem [resolvable:$true] %s26_s25 }
   0x4   :  { %s630_s26 = scalar_lea.vmem %s27_s25, 4096  ;;  %p635_p1 = scmp.lt.s32.totalorder %s27_s25, %s27_s25 }
   0x5   :  { %p631_p0 = scmp.ne.s32.totalorder %s27_s25, %s630_s26  ;;  %p636_p2 = scmp.lt.s32.totalorder %s630_s26, %s630_s26 }
   0x7   :  { %p637_p3 = por %p636_p2, %p635_p1 }
   0x9   :  { %p638_p4 = pnand %p637_p3, %p631_p0 }
   0xb   :  { %641 = shalt.err (!%p638_p4)
}
   0xc   :  { %s689_s27 = smov 128   ;;  %s690_s28 = smov 8  }
   0xd   :  { %32 = dma.hbm_to_vmem [thread:$0]  %s822_s3, 4096, %s27_s25, [#allocation3], %s689_s27, %s689_s27, %s690_s28  }
   0xe   :  { %s691_s8 = smov [#allocation5]  }
   0xf   :  { %s40_s9 = sshll.u32 %s691_s8, 4  ;;  %s41_s9 = int_to_ptr.vmem [resolvable:$true] %s40_s9 }
  0x10   :  { %s650_s10 = scalar_lea.vmem %s41_s9, 2048  ;;  %p655_p6 = scmp.lt.s32.totalorder %s41_s9, %s41_s9 }
  0x11   :  { %p651_p5 = scmp.ne.s32.totalorder %s41_s9, %s650_s10  ;;  %p656_p7 = scmp.lt.s32.totalorder %s650_s10, %s650_s10 }
  0x13   :  { %p657_p8 = por %p656_p7, %p655_p6 }
  0x15   :  { %p658_p9 = pnand %p657_p8, %p651_p5 }
  0x17   :  { %661 = shalt.err (!%p658_p9)
}
  0x18   :  { %46 = dma.hbm_to_vmem [thread:$0]  %s824_s5, 2048, %s41_s9, [#allocation6], %s689_s27, %s689_s27, %s690_s28  }
  0x19   :  { %682 = dma.done.wait [#allocation3], 4096  }
  0x1a   :  { %683 = vsyncadd [#allocation3], 4294963200 }
  0x1b   :  { %684 = dma.done.wait [#allocation6], 2048  }
  0x1c   :  { %685 = vsyncadd [#allocation6], 4294965248  ;;  %v692_v0 = vmov 0.0   ;;  %vm693_vm0 = vmmov 0   ;;  %vm68_vm1 = vcmask 1043456   ;;  %vm64_vm2 = vcmask 31744  }
  0x1d   :  { %505 = vmatprep.subr.mxu0 %v692_v0  ;;  %507 = vmatprep.mubr.msk.f32.mxu0 %vm693_vm0, %v692_v0  ;;  %v56_v1 = vld [vmem:[%s820_s1] sm:$0xf]  ;;  %v158_v3 = vld [vmem:[#allocation2 + $0x78] sm:$0xff]  ;;  %v157_v4 = vld [vmem:[#allocation2 + $0x70] sm:$0xff]  ;;  %s694_s20 = smov [#allocation7]  }
  0x1e   :  { %510 = vmatprep.subr.mxu1 %v692_v0  ;;  %542 = vmatprep.mubr.msk.f32.mxu1 %vm693_vm0, %v692_v0  ;;  %v55_v2 = vld [vmem:[%s819_s0] sm:$0xff]  ;;  %v156_v5 = vld [vmem:[#allocation2 + $0x68] sm:$0xff]  ;;  %v154_v7 = vld [vmem:[#allocation2 + $0x58] sm:$0xff]  ;;  %s435_s21 = sshll.u32 %s694_s20, 4  ;;  %s436_s21 = int_to_ptr.vmem [resolvable:$true] %s435_s21 }
  0x1f   :  { %506 = vmatpush3.msk.msra.mxu0 %vm68_vm1, %v56_v1  ;;  %511 = vmatpush3.msra.mxu1 %v158_v3  ;;  %v155_v6 = vld [vmem:[#allocation2 + $0x60] sm:$0xff]  ;;  %v153_v8 = vld [vmem:[#allocation2 + $0x50] sm:$0xff]  ;;  %v152_v9 = vld [vmem:[#allocation2 + $0x48] sm:$0xff]  ;;  %s662_s22 = scalar_lea.vmem %s436_s21, 128  ;;  %p667_p11 = scmp.lt.s32.totalorder %s436_s21, %s436_s21 }
  0x20   :  { %508 = vmatmul.mubr.msk.f32.vlgmr.msra.gmra.mxu0 %vm64_vm2, %v55_v2  ;;  %512 = vmatprep.subr.mxu1 %v692_v0  ;;  %v151_v10 = vld [vmem:[#allocation2 + $0x40] sm:$0xff]  ;;  %v150_v11 = vld [vmem:[#allocation2 + $0x38] sm:$0xff]  ;;  %v149_v12 = vld [vmem:[#allocation2 + $0x30] sm:$0xff]  ;;  %p663_p10 = scmp.ne.s32.totalorder %s436_s21, %s662_s22  ;;  %p668_p12 = scmp.lt.s32.totalorder %s662_s22, %s662_s22 }
  0x21   :  { %513 = vmatpush3.msra.mxu1 %v157_v4  ;;  %545 = vmatprep.subr.mxu0 %v692_v0  ;;  %v148_v13 = vld [vmem:[#allocation2 + $0x28] sm:$0xff]  ;;  %v147_v14 = vld [vmem:[#allocation2 + $0x20] sm:$0xff]  ;;  %v146_v15 = vld [vmem:[#allocation2 + $0x18] sm:$0xff] }
  0x22   :  { %514 = vmatprep.subr.mxu1 %v692_v0  ;;  %577 = vmatprep.mubr.msk.f32.mxu0 %vm693_vm0, %v692_v0  ;;  %v145_v16 = vld [vmem:[#allocation2 + $0x10] sm:$0xff]  ;;  %v144_v17 = vld [vmem:[#allocation2 + $0x8] sm:$0xff]  ;;  %v143_v18 = vld [vmem:[#allocation2] sm:$0xff]  ;;  %p669_p13 = por %p668_p12, %p667_p11 }
  0x23   :  { %515 = vmatpush3.msra.mxu1 %v156_v5  ;;  %v254_v19 = vld [vmem:[#allocation2 + $0xf8] sm:$0xff]  ;;  %v253_v20 = vld [vmem:[#allocation2 + $0xf0] sm:$0xff]  ;;  %v252_v21 = vld [vmem:[#allocation2 + $0xe8] sm:$0xff] }
  0x24   :  { %516 = vmatprep.subr.mxu1 %v692_v0  ;;  %546 = vmatpush3.msra.mxu0 %v254_v19  ;;  %v251_v22 = vld [vmem:[#allocation2 + $0xe0] sm:$0xff]  ;;  %v250_v23 = vld [vmem:[#allocation2 + $0xd8] sm:$0xff]  ;;  %v249_v24 = vld [vmem:[#allocation2 + $0xd0] sm:$0xff]  ;;  %p670_p0 = pnand %p669_p13, %p663_p10 }
  0x25   :  { %517 = vmatpush3.msra.mxu1 %v155_v6  ;;  %547 = vmatprep.subr.mxu0 %v692_v0  ;;  %v248_v25 = vld [vmem:[#allocation2 + $0xc8] sm:$0xff]  ;;  %v247_v26 = vld [vmem:[#allocation2 + $0xc0] sm:$0xff]  ;;  %v246_v27 = vld [vmem:[#allocation2 + $0xb8] sm:$0xff] }
  0x26   :  { %518 = vmatprep.subr.mxu1 %v692_v0  ;;  %548 = vmatpush3.msra.mxu0 %v253_v20  ;;  %v245_v28 = vld [vmem:[#allocation2 + $0xb0] sm:$0xff]  ;;  %v244_v29 = vld [vmem:[#allocation2 + $0xa8] sm:$0xff]  ;;  %v243_v30 = vld [vmem:[#allocation2 + $0xa0] sm:$0xff] }
  0x27   :  { %519 = vmatpush3.msra.mxu1 %v154_v7  ;;  %549 = vmatprep.subr.mxu0 %v692_v0  ;;  %v445_v31 = vld [vmem:[%s821_s2] ss:$0 sm:$0xff]  ;;  %v242_v36 = vld [vmem:[#allocation2 + $0x98] sm:$0xff]  ;;  %v241_v37 = vld [vmem:[#allocation2 + $0x90] sm:$0xff] }
  0x28   :  { %520 = vmatprep.subr.mxu1 %v692_v0  ;;  %550 = vmatpush3.msra.mxu0 %v252_v21  ;;  %v240_v38 = vld [vmem:[#allocation2 + $0x88] sm:$0xff]  ;;  %v239_v39 = vld [vmem:[#allocation2 + $0x80] sm:$0xff]  ;;  %v350_v40 = vld [vmem:[#allocation5 + $0x78] sm:$0xff] }
  0x29   :  { %521 = vmatpush3.msra.mxu1 %v153_v8  ;;  %551 = vmatprep.subr.mxu0 %v692_v0  ;;  %v349_v41 = vld [vmem:[#allocation5 + $0x70] sm:$0xff]  ;;  %v348_v42 = vld [vmem:[#allocation5 + $0x68] sm:$0xff]  ;;  %v347_v43 = vld [vmem:[#allocation5 + $0x60] sm:$0xff] }
  0x2a   :  { %522 = vmatprep.subr.mxu1 %v692_v0  ;;  %552 = vmatpush3.msra.mxu0 %v251_v22  ;;  %v346_v44 = vld [vmem:[#allocation5 + $0x58] sm:$0xff]  ;;  %v345_v45 = vld [vmem:[#allocation5 + $0x50] sm:$0xff]  ;;  %v344_v46 = vld [vmem:[#allocation5 + $0x48] sm:$0xff] }
  0x2b   :  { %523 = vmatpush3.msra.mxu1 %v152_v9  ;;  %553 = vmatprep.subr.mxu0 %v692_v0  ;;  %v343_v47 = vld [vmem:[#allocation5 + $0x40] sm:$0xff]  ;;  %v342_v48 = vld [vmem:[#allocation5 + $0x38] sm:$0xff]  ;;  %v341_v49 = vld [vmem:[#allocation5 + $0x30] sm:$0xff] }
  0x2c   :  { %524 = vmatprep.subr.mxu1 %v692_v0  ;;  %554 = vmatpush3.msra.mxu0 %v250_v23  ;;  %v340_v50 = vld [vmem:[#allocation5 + $0x28] sm:$0xff]  ;;  %v339_v51 = vld [vmem:[#allocation5 + $0x20] sm:$0xff]  ;;  %v338_v58 = vld [vmem:[#allocation5 + $0x18] sm:$0xff] }
  0x2d   :  { %525 = vmatpush3.msra.mxu1 %v151_v10  ;;  %555 = vmatprep.subr.mxu0 %v692_v0  ;;  %v448_v52 = vld [vmem:[%s823_s4] ss:$0 sm:$0xff]  ;;  %v337_v59 = vld [vmem:[#allocation5 + $0x10] sm:$0xff]  ;;  %v336_v60 = vld [vmem:[#allocation5 + $0x8] sm:$0xff] }
  0x2e   :  { %526 = vmatprep.subr.mxu1 %v692_v0  ;;  %556 = vmatpush3.msra.mxu0 %v249_v24  ;;  %v335_v61 = vld [vmem:[#allocation5] sm:$0xff] }
  0x2f   :  { %527 = vmatpush3.msra.mxu1 %v150_v11  ;;  %557 = vmatprep.subr.mxu0 %v692_v0  ;;  %v450_v62 = vld [vmem:[%s823_s4 + $0x1] ss:$0 sm:$0xff]  ;;  %v451_v5 = vld [vmem:[%s825_s6] ss:$0 sm:$0xff] }
  0x30   :  { %528 = vmatprep.subr.mxu1 %v692_v0  ;;  %558 = vmatpush3.msra.mxu0 %v248_v25 }
  0x31   :  { %529 = vmatpush3.msra.mxu1 %v149_v12  ;;  %559 = vmatprep.subr.mxu0 %v692_v0 }
  0x32   :  { %530 = vmatprep.subr.mxu1 %v692_v0  ;;  %560 = vmatpush3.msra.mxu0 %v247_v26 }
  0x33   :  { %531 = vmatpush3.msra.mxu1 %v148_v13  ;;  %561 = vmatprep.subr.mxu0 %v692_v0 }
  0x34   :  { %532 = vmatprep.subr.mxu1 %v692_v0  ;;  %562 = vmatpush3.msra.mxu0 %v246_v27 }
  0x35   :  { %533 = vmatpush3.msra.mxu1 %v147_v14  ;;  %563 = vmatprep.subr.mxu0 %v692_v0 }
  0x36   :  { %534 = vmatprep.subr.mxu1 %v692_v0  ;;  %564 = vmatpush3.msra.mxu0 %v245_v28 }
  0x37   :  { %535 = vmatpush3.msra.mxu1 %v146_v15  ;;  %565 = vmatprep.subr.mxu0 %v692_v0 }
  0x38   :  { %536 = vmatprep.subr.mxu1 %v692_v0  ;;  %566 = vmatpush3.msra.mxu0 %v244_v29 }
  0x39   :  { %537 = vmatpush3.msra.mxu1 %v145_v16  ;;  %567 = vmatprep.subr.mxu0 %v692_v0 }
  0x3a   :  { %538 = vmatprep.subr.mxu1 %v692_v0  ;;  %568 = vmatpush3.msra.mxu0 %v243_v30 }
  0x3b   :  { %539 = vmatpush3.msra.mxu1 %v144_v17  ;;  %569 = vmatprep.subr.mxu0 %v692_v0 }
  0x3c   :  { %540 = vmatprep.subr.mxu1 %v692_v0  ;;  %570 = vmatpush3.msra.mxu0 %v242_v36 }
  0x3d   :  { %541 = vmatpush3.msra.mxu1 %v143_v18  ;;  %571 = vmatprep.subr.mxu0 %v692_v0 }
  0x3e   :  { %580 = vmatprep.subr.mxu1 %v692_v0  ;;  %572 = vmatpush3.msra.mxu0 %v241_v37 }
  0x3f   :  { %573 = vmatprep.subr.mxu0 %v692_v0 }
  0x40   :  { %574 = vmatpush3.msra.mxu0 %v240_v38 }
  0x41   :  { %575 = vmatprep.subr.mxu0 %v692_v0 }
  0x42   :  { %576 = vmatpush3.msra.mxu0 %v239_v39 }
  0xe0   :  { %v138_v32 = vpop.f32.mrf.mxu0 }
  0xe1   :  { %v139_v33 = vadd.f32 %v445_v31, %v138_v32 }
  0xe2   :  { %v509_v34 = vpop.f32.mrf.mxu0 }
  0xe3   :  { %v142_v35 = vmax.f32 %v139_v33, 0.0 }
  0xe5   :  { %543 = vmatmul.mubr.f32.vlgmr.msra.gmra.mxu1 %v142_v35 }
  0xe6   :  { %612 = vmatprep.mubr.msk.f32.mxu1 %vm693_vm0, %v692_v0  ;;  %581 = vmatpush3.msra.mxu1 %v350_v40 }
  0xe7   :  { %582 = vmatprep.subr.mxu1 %v692_v0 }
  0xe8   :  { %583 = vmatpush3.msra.mxu1 %v349_v41 }
  0xe9   :  { %584 = vmatprep.subr.mxu1 %v692_v0 }
  0xea   :  { %585 = vmatpush3.msra.mxu1 %v348_v42 }
  0xeb   :  { %586 = vmatprep.subr.mxu1 %v692_v0 }
  0xec   :  { %587 = vmatpush3.msra.mxu1 %v347_v43 }
  0xed   :  { %588 = vmatprep.subr.mxu1 %v692_v0 }
  0xee   :  { %589 = vmatpush3.msra.mxu1 %v346_v44 }
  0xef   :  { %590 = vmatprep.subr.mxu1 %v692_v0 }
  0xf0   :  { %591 = vmatpush3.msra.mxu1 %v345_v45 }
  0xf1   :  { %592 = vmatprep.subr.mxu1 %v692_v0 }
  0xf2   :  { %593 = vmatpush3.msra.mxu1 %v344_v46 }
  0xf3   :  { %594 = vmatprep.subr.mxu1 %v692_v0 }
  0xf4   :  { %595 = vmatpush3.msra.mxu1 %v343_v47 }
  0xf5   :  { %596 = vmatprep.subr.mxu1 %v692_v0 }
  0xf6   :  { %597 = vmatpush3.msra.mxu1 %v342_v48 }
  0xf7   :  { %598 = vmatprep.subr.mxu1 %v692_v0 }
  0xf8   :  { %599 = vmatpush3.msra.mxu1 %v341_v49 }
  0xf9   :  { %600 = vmatprep.subr.mxu1 %v692_v0 }
  0xfa   :  { %601 = vmatpush3.msra.mxu1 %v340_v50 }
  0xfb   :  { %602 = vmatprep.subr.mxu1 %v692_v0 }
  0xfc   :  { %603 = vmatpush3.msra.mxu1 %v339_v51 }
  0xfd   :  { %604 = vmatprep.subr.mxu1 %v692_v0 }
  0xfe   :  { %605 = vmatpush3.msra.mxu1 %v338_v58 }
  0xff   :  { %606 = vmatprep.subr.mxu1 %v692_v0 }
 0x100   :  { %607 = vmatpush3.msra.mxu1 %v337_v59 }
 0x101   :  { %608 = vmatprep.subr.mxu1 %v692_v0 }
 0x102   :  { %609 = vmatpush3.msra.mxu1 %v336_v60 }
 0x103   :  { %610 = vmatprep.subr.mxu1 %v692_v0 }
 0x104   :  { %611 = vmatpush3.msra.mxu1 %v335_v61 }
 0x1a5   :  { %v232_v53 = vpop.f32.mrf.mxu1 }
 0x1a6   :  { %v233_v54 = vadd.f32 %v448_v52, %v232_v53 }
 0x1a7   :  { %v544_v55 = vpop.f32.mrf.mxu1 }
 0x1a8   :  { %v236_v56 = vmax.f32 %v233_v54, 0.0 }
 0x1aa   :  { %v237_v57 = vadd.f32 %v236_v56, %v142_v35 }
 0x1ac   :  { %578 = vmatmul.mubr.f32.vlgmr.msra.gmra.mxu0 %v237_v57 }
 0x26c   :  { %v329_v63 = vpop.f32.mrf.mxu0 }
 0x26d   :  { %v330_v1 = vadd.f32 %v450_v62, %v329_v63 }
 0x26e   :  { %v579_v2 = vpop.f32.mrf.mxu0 }
 0x26f   :  { %v333_v3 = vmax.f32 %v330_v1, 0.0 }
 0x271   :  { %v334_v4 = vadd.f32 %v333_v3, %v237_v57 }
 0x273   :  { %613 = vmatmul.mubr.f32.vlgmr.msra.gmra.mxu1 %v334_v4 }
 0x333   :  { %v424_v6 = vpop.f32.mrf.mxu1 }
 0x334   :  { %v425_v0 = vadd.f32 %v451_v5, %v424_v6 }
 0x335   :  { %v614_v7 = vpop.f32.mrf.mxu1 }
 0x336   :  { %428 = vst [vmem:[#allocation7] sm:$0xff] %v425_v0 }
 0x337   :  { %673 = shalt.err (!%p670_p0)
}
 0x338   :  { %438 = dma.vmem_to_hbm [thread:$0]  %s436_s21, 128, %s826_s7, [#allocation4]  }
 0x339   :  { %686 = dma.done.wait [#allocation4], 128  }
 0x33a   :  { %687 = vsyncadd [#allocation4], 4294967168 }
 0x33b   :  { %442 = vsyncpa [#allocation3], 1 }
 0x33c   :  { %443 = vsyncpa [#allocation6], 1 }
 0x33d   :  { %444 = vsyncpa [#allocation4], 1 }

</bundles_post_ra>
